<compile_context>
chip_gen: v7x
topology: tpu7x:2x2x1
jax: 0.10.0
libtpu: 0.0.40
codegen_flags: <defaults>
</compile_context>

<pallas_src>
import jax
import jax.numpy as jnp
import numpy as np
from jax import lax
from jax.experimental import pallas as pl
from jax.experimental.pallas import tpu as pltpu


def _lstm_classifier_kernel(x_ref, wih_ref, whh_ref, b_ref, wout_ref, bout_ref,
                            out_ref, h_sc, c_sc, xp_sc):
    # x_ref:    (Tt, Bp, E)   f32  -- embedded tokens for this time tile
    # wih_ref:  (E, 4H)       f32  -- stacked gates, order [i, f, o, g]
    # whh_ref:  (H, 4H)       f32
    # b_ref:    (1, 4H)       f32  -- b_ih + b_hh
    # wout_ref: (H, L)        f32
    # bout_ref: (1, L)        f32
    # out_ref:  (Bp, L)       f32  -- log-probabilities (written on last grid step)
    # h_sc/c_sc:(Bp, H)       f32  -- hidden / cell state, persist across grid steps
    # xp_sc:    (Tt, Bp, 4H)  f32  -- per-tile hoisted input projection (aligned slices)
    tt, bp, _ = x_ref.shape
    H = whh_ref.shape[0]

    @pl.when(pl.program_id(0) == 0)
    def _init():
        h_sc[...] = jnp.zeros_like(h_sc)
        c_sc[...] = jnp.zeros_like(c_sc)

    # Input projection hoisted out of the recurrence: one (Tt*Bp, E) x (E, 4H) matmul.
    x2d = x_ref[...].reshape(tt * bp, -1)
    xp = jnp.dot(x2d, wih_ref[...], preferred_element_type=jnp.float32) + b_ref[...]
    xp_sc[...] = xp.reshape(tt, bp, 4 * H)

    whh = whh_ref[...]                                              # hoisted load

    def step(t, carry):
        h = h_sc[...]                                               # (Bp, H)
        pre = xp_sc[t] + jnp.dot(h, whh,
                                 preferred_element_type=jnp.float32)  # (Bp, 4H)
        # Full-vreg nonlinearities (EUP is vreg-granular), then static lane slices.
        sig = jax.nn.sigmoid(pre)
        tnh = jnp.tanh(pre)
        i_g = sig[:, 0:H]
        f_g = sig[:, H:2 * H]
        o_g = sig[:, 2 * H:3 * H]
        g_g = tnh[:, 3 * H:4 * H]
        c_new = f_g * c_sc[...] + i_g * g_g
        h_sc[...] = o_g * jnp.tanh(c_new)
        c_sc[...] = c_new
        return carry

    # Serially dependent recurrence: bounded unroll keeps LLO visibility without
    # code-size / vreg blowup when the time tile is large.
    lax.fori_loop(0, tt, step, 0, unroll=min(tt, 8))

    @pl.when(pl.program_id(0) == pl.num_programs(0) - 1)
    def _epilogue():
        # hidden2label on the final hidden state, then log_softmax over labels.
        logits = (jnp.dot(h_sc[...], wout_ref[...],
                          preferred_element_type=jnp.float32)
                  + bout_ref[...])                                   # (Bp, L)
        m = jnp.max(logits, axis=-1, keepdims=True)
        shifted = logits - m
        lse = jnp.log(jnp.sum(jnp.exp(shifted), axis=-1, keepdims=True))
        out_ref[...] = shifted - lse


def _choose_time_tile(T, Bp, E, H, budget_bytes):
    """Largest Tt dividing T whose (double-buffered x tile + xp scratch) fits budget."""
    def tile_bytes(tt):
        x_tile = tt * Bp * E * 4
        xp = tt * Bp * 4 * H * 4
        return 2 * x_tile + xp          # x is double-buffered by the pipeline
    if tile_bytes(T) <= budget_bytes:
        return T
    for tt in range(T - 1, 0, -1):
        if T % tt == 0 and tile_bytes(tt) <= budget_bytes:
            return tt
    return 1


def lstm_classifier_forward(sentence, params, *, time_tile=None,
                            vmem_tile_budget_bytes=12 * 1024 * 1024):
    """sentence: (T, B) int32 token ids. Returns (B, L) log-probs."""
    # TODO(synk): once T*B*E is large, gather embeddings inside the kernel via
    # PrefetchScalarGridSpec + pl.Element index_map instead of materializing x in HBM.
    x = params["embedding"][sentence]            # (T, B, E) -- gather glue in plain JAX
    T, B, E = x.shape
    wih = params["w_ih_stacked"]                 # (E, 4H)
    whh = params["w_hh_stacked"]                 # (H, 4H)
    b = params["b_stacked"]                      # (1, 4H)
    wout = params["w_out"]                       # (H, L)
    bout = params["b_out"]                       # (1, L)
    H = whh.shape[0]
    L = wout.shape[-1]

    # Pad batch to the f32 sublane multiple (8): dense vregs, unmasked h/c/out stores.
    Bp = -(-B // 8) * 8
    if Bp != B:
        x = jnp.pad(x, ((0, 0), (0, Bp - B), (0, 0)))

    # Collapse the time grid whenever the tile fits VMEM (grid=(1,) in the common case).
    # Never pad T: zero-input steps would still update the state through the biases.
    if time_tile is None:
        Tt = _choose_time_tile(T, Bp, E, H, vmem_tile_budget_bytes)
    else:
        Tt = min(time_tile, T)
        while T % Tt:
            Tt -= 1
    grid = (T // Tt,)

    out = pl.pallas_call(
        _lstm_classifier_kernel,
        out_shape=jax.ShapeDtypeStruct((Bp, L), jnp.float32),
        grid=grid,
        in_specs=[
            pl.BlockSpec((Tt, Bp, E), lambda t: (t, 0, 0)),      # x: pipelined over T
            pl.BlockSpec((E, 4 * H), lambda t: (0, 0)),          # weights stay resident
            pl.BlockSpec((H, 4 * H), lambda t: (0, 0)),
            pl.BlockSpec((1, 4 * H), lambda t: (0, 0)),
            pl.BlockSpec((H, L), lambda t: (0, 0)),
            pl.BlockSpec((1, L), lambda t: (0, 0)),
        ],
        out_specs=pl.BlockSpec((Bp, L), lambda t: (0, 0)),       # resident; written last
        scratch_shapes=[
            pltpu.VMEM((Bp, H), jnp.float32),                    # h
            pltpu.VMEM((Bp, H), jnp.float32),                    # c
            pltpu.VMEM((Tt, Bp, 4 * H), jnp.float32),            # hoisted x @ W_ih + b
        ],
        compiler_params=pltpu.CompilerParams(
            dimension_semantics=("arbitrary",)),                 # sequential recurrence
        # TODO(synk): on v7x with Bp >= 16, add a leading "parallel" batch grid axis so
        # the second TensorCore gets half the batch (time stays "arbitrary").
        # TODO(synk): for large H on v7x (64 MiB VMEM), tile the 4H axis of W_hh/xp_sc
        # and set vmem_limit_bytes explicitly; unnecessary at these small shapes.
    )(x, wih, whh, b, wout, bout)
    return out[:B]


def init_params(key, vocab_size, embedding_dim, hidden_dim, label_size):
    """Per-gate params in PyTorch gate order [i, f, g, o] (used by the reference)."""
    ks = jax.random.split(key, 7)
    E, H, L, V = embedding_dim, hidden_dim, label_size, vocab_size
    k = 1.0 / np.sqrt(H)
    return {
        "embedding": jax.random.normal(ks[0], (V, E), jnp.float32),
        # PyTorch weight_ih_l0 is (4H, E); we store W_k.T per gate: (4, E, H)
        "w_ih": jax.random.uniform(ks[1], (4, E, H), jnp.float32, -k, k),
        "w_hh": jax.random.uniform(ks[2], (4, H, H), jnp.float32, -k, k),
        # b = b_ih + b_hh, per gate, broadcastable to (B, H)
        "b": (jax.random.uniform(ks[3], (4, 1, H), jnp.float32, -k, k)
              + jax.random.uniform(ks[4], (4, 1, H), jnp.float32, -k, k)),
        # Linear(H, L): PyTorch weight is (L, H); we store W.T: (H, L)
        "w_out": jax.random.uniform(ks[5], (H, L), jnp.float32, -k, k),
        "b_out": jax.random.uniform(ks[6], (1, L), jnp.float32, -k, k),
    }


_KERNEL_GATE_ORDER = (0, 1, 3, 2)   # PyTorch [i, f, g, o]  ->  kernel [i, f, o, g]


def stack_gate_params(params):
    """Repack per-gate PyTorch-ordered weights into the kernel's stacked layout."""
    p = dict(params)
    p["w_ih_stacked"] = jnp.concatenate(
        [params["w_ih"][g] for g in _KERNEL_GATE_ORDER], axis=-1)   # (E, 4H)
    p["w_hh_stacked"] = jnp.concatenate(
        [params["w_hh"][g] for g in _KERNEL_GATE_ORDER], axis=-1)   # (H, 4H)
    p["b_stacked"] = jnp.concatenate(
        [params["b"][g] for g in _KERNEL_GATE_ORDER], axis=-1)      # (1, 4H)
    return p


def reference_forward(sentence, params):
    """Pure-JAX reference matching the PyTorch semantics (per-gate, [i, f, g, o])."""
    x = params["embedding"][sentence]            # (T, B, E)
    T, B, _ = x.shape
    H = params["w_hh"].shape[-1]
    h = jnp.zeros((B, H), jnp.float32)
    c = jnp.zeros((B, H), jnp.float32)
    for t in range(T):
        xt = x[t]
        pre = [xt @ params["w_ih"][g] + h @ params["w_hh"][g] + params["b"][g]
               for g in range(4)]
        i_g = jax.nn.sigmoid(pre[0])
        f_g = jax.nn.sigmoid(pre[1])
        g_g = jnp.tanh(pre[2])
        o_g = jax.nn.sigmoid(pre[3])
        c = f_g * c + i_g * g_g
        h = o_g * jnp.tanh(c)
    logits = h @ params["w_out"] + params["b_out"]
    return jax.nn.log_softmax(logits, axis=-1)


if __name__ == "__main__":
    # Small shapes consistent with the module's forward.
    vocab_size = 64
    embedding_dim = 16
    hidden_dim = 32
    label_size = 4
    batch_size = 2
    seq_len = 8

    key = jax.random.PRNGKey(0)
    pkey, skey = jax.random.split(key)
    params = init_params(pkey, vocab_size, embedding_dim, hidden_dim, label_size)
    kparams = stack_gate_params(params)
    sentence = jax.random.randint(skey, (seq_len, batch_size), 0, vocab_size,
                                  dtype=jnp.int32)

    out = lstm_classifier_forward(sentence, kparams)   # default: grid=(1,)
    out = jax.block_until_ready(out)

    ref = reference_forward(sentence, params)
    np.testing.assert_allclose(np.asarray(out), np.asarray(ref),
                               rtol=1e-4, atol=1e-5)
    print("KERNEL_OK")
</pallas_src>

<mosaic_0001>
module attributes {stable_mosaic.version = 11 : i64} {
  func.func @_lstm_classifier_kernel(%arg0: i32, %arg1: memref<8x8x16xf32, #tpu.memory_space<vmem>>, %arg2: memref<16x128xf32, #tpu.memory_space<vmem>>, %arg3: memref<32x128xf32, #tpu.memory_space<vmem>>, %arg4: memref<1x128xf32, #tpu.memory_space<vmem>>, %arg5: memref<32x4xf32, #tpu.memory_space<vmem>>, %arg6: memref<1x4xf32, #tpu.memory_space<vmem>>, %arg7: memref<8x4xf32, #tpu.memory_space<vmem>>, %arg8: memref<8x32xf32, #tpu.memory_space<vmem>>, %arg9: memref<8x32xf32, #tpu.memory_space<vmem>>, %arg10: memref<8x8x128xf32, #tpu.memory_space<vmem>>) attributes {dimension_semantics = [#tpu.dimension_semantics<arbitrary>], iteration_bounds = array<i64: 1>, scalar_prefetch = 0 : i64, scratch_operands = 3 : i64, tpu.core_type = #tpu.core_type<tc>, window_params = [{transform_indices = @transform_0, window_bounds = array<i64: 8, 8, 16>}, {pipeline_mode = #tpu.pipeline_mode<synchronous>, transform_indices = @transform_1, window_bounds = array<i64: 16, 128>}, {pipeline_mode = #tpu.pipeline_mode<synchronous>, transform_indices = @transform_2, window_bounds = array<i64: 32, 128>}, {pipeline_mode = #tpu.pipeline_mode<synchronous>, transform_indices = @transform_3, window_bounds = array<i64: 1, 128>}, {pipeline_mode = #tpu.pipeline_mode<synchronous>, transform_indices = @transform_4, window_bounds = array<i64: 32, 4>}, {pipeline_mode = #tpu.pipeline_mode<synchronous>, transform_indices = @transform_5, window_bounds = array<i64: 1, 4>}, {pipeline_mode = #tpu.pipeline_mode<synchronous>, transform_indices = @transform_6, window_bounds = array<i64: 8, 4>}]} {
    %c0_i32 = arith.constant 0 : i32
    %0 = arith.cmpi eq, %arg0, %c0_i32 : i32
    %1 = arith.extui %0 : i1 to i32
    %c0_i32_0 = arith.constant 0 : i32
    %2 = arith.cmpi ne, %1, %c0_i32_0 : i32
    scf.if %2 {
      %cst_111 = arith.constant 0.000000e+00 : f32
      %208 = vector.broadcast %cst_111 : f32 to vector<8x32xf32>
      %c0_112 = arith.constant 0 : index
      %c0_113 = arith.constant 0 : index
      %209 = vector.load %arg8[%c0_112, %c0_113] : memref<8x32xf32, #tpu.memory_space<vmem>>, vector<8x32xf32>
      tpu.vector_store %arg8[%c0_112, %c0_113], %208 {strides = array<i32>} : memref<8x32xf32, #tpu.memory_space<vmem>>, vector<8x32xf32>,
      %cst_114 = arith.constant 0.000000e+00 : f32
      %210 = vector.broadcast %cst_114 : f32 to vector<8x32xf32>
      %c0_115 = arith.constant 0 : index
      %c0_116 = arith.constant 0 : index
      %211 = vector.load %arg9[%c0_115, %c0_116] : memref<8x32xf32, #tpu.memory_space<vmem>>, vector<8x32xf32>
      tpu.vector_store %arg9[%c0_115, %c0_116], %210 {strides = array<i32>} : memref<8x32xf32, #tpu.memory_space<vmem>>, vector<8x32xf32>,
    } else {
    }
    %c0 = arith.constant 0 : index
    %c0_1 = arith.constant 0 : index
    %c0_2 = arith.constant 0 : index
    %3 = vector.load %arg1[%c0, %c0_1, %c0_2] : memref<8x8x16xf32, #tpu.memory_space<vmem>>, vector<8x8x16xf32>
    %4 = vector.shape_cast %3 : vector<8x8x16xf32> to vector<64x16xf32>
    %c0_3 = arith.constant 0 : index
    %c0_4 = arith.constant 0 : index
    %5 = vector.load %arg2[%c0_3, %c0_4] : memref<16x128xf32, #tpu.memory_space<vmem>>, vector<16x128xf32>
    %cst = arith.constant dense<0.000000e+00> : vector<64x128xf32>
    %6 = tpu.matmul %4, %5, %cst {dimension_numbers = #tpu.dot_dimension_numbers<[1], [0], [0], [1], [0, 0, 1, 1], [], []>} : vector<64x16xf32>, vector<16x128xf32>, vector<64x128xf32> -> vector<64x128xf32>
    %c0_5 = arith.constant 0 : index
    %c0_6 = arith.constant 0 : index
    %7 = vector.load %arg4[%c0_5, %c0_6] : memref<1x128xf32, #tpu.memory_space<vmem>>, vector<1x128xf32>
    %8 = vector.broadcast %7 : vector<1x128xf32> to vector<64x128xf32>
    %9 = arith.addf %6, %8 : vector<64x128xf32>
    %10 = vector.shape_cast %9 : vector<64x128xf32> to vector<8x8x128xf32>
    %c0_7 = arith.constant 0 : index
    %c0_8 = arith.constant 0 : index
    %c0_9 = arith.constant 0 : index
    %11 = vector.load %arg10[%c0_7, %c0_8, %c0_9] : memref<8x8x128xf32, #tpu.memory_space<vmem>>, vector<8x8x128xf32>
    tpu.vector_store %arg10[%c0_7, %c0_8, %c0_9], %10 {strides = array<i32>} : memref<8x8x128xf32, #tpu.memory_space<vmem>>, vector<8x8x128xf32>,
    %c0_10 = arith.constant 0 : index
    %c0_11 = arith.constant 0 : index
    %12 = vector.load %arg3[%c0_10, %c0_11] : memref<32x128xf32, #tpu.memory_space<vmem>>, vector<32x128xf32>
    %c0_i32_12 = arith.constant 0 : i32
    %c0_13 = arith.constant 0 : index
    %c0_14 = arith.constant 0 : index
    %13 = vector.load %arg8[%c0_13, %c0_14] : memref<8x32xf32, #tpu.memory_space<vmem>>, vector<8x32xf32>
    %14 = arith.index_cast %c0_i32_12 : i32 to index
    %c0_15 = arith.constant 0 : index
    %c0_16 = arith.constant 0 : index
    %15 = vector.load %arg10[%14, %c0_15, %c0_16] : memref<8x8x128xf32, #tpu.memory_space<vmem>>, vector<1x8x128xf32>
    %16 = vector.shape_cast %15 : vector<1x8x128xf32> to vector<8x128xf32>
    %cst_17 = arith.constant dense<0.000000e+00> : vector<8x128xf32>
    %17 = tpu.matmul %13, %12, %cst_17 {dimension_numbers = #tpu.dot_dimension_numbers<[1], [0], [0], [1], [0, 0, 1, 1], [], []>} : vector<8x32xf32>, vector<32x128xf32>, vector<8x128xf32> -> vector<8x128xf32>
    %18 = arith.addf %16, %17 : vector<8x128xf32>
    %19 = arith.negf %18 : vector<8x128xf32>
    %20 = math.exp %19 : vector<8x128xf32>
    %cst_18 = arith.constant 1.000000e+00 : f32
    %21 = vector.broadcast %cst_18 : f32 to vector<8x128xf32>
    %22 = arith.addf %21, %20 : vector<8x128xf32>
    %23 = arith.divf %21, %22 : vector<8x128xf32>
    %24 = math.tanh %18 : vector<8x128xf32>
    %25 = vector.extract_strided_slice %23 {offsets = [0, 0], sizes = [8, 32], strides = [1, 1]} : vector<8x128xf32> to vector<8x32xf32>
    %26 = vector.extract_strided_slice %23 {offsets = [0, 32], sizes = [8, 32], strides = [1, 1]} : vector<8x128xf32> to vector<8x32xf32>
    %27 = vector.extract_strided_slice %23 {offsets = [0, 64], sizes = [8, 32], strides = [1, 1]} : vector<8x128xf32> to vector<8x32xf32>
    %28 = vector.extract_strided_slice %24 {offsets = [0, 96], sizes = [8, 32], strides = [1, 1]} : vector<8x128xf32> to vector<8x32xf32>
    %c0_19 = arith.constant 0 : index
    %c0_20 = arith.constant 0 : index
    %29 = vector.load %arg9[%c0_19, %c0_20] : memref<8x32xf32, #tpu.memory_space<vmem>>, vector<8x32xf32>
    %30 = arith.mulf %26, %29 : vector<8x32xf32>
    %31 = arith.mulf %25, %28 : vector<8x32xf32>
    %32 = arith.addf %30, %31 : vector<8x32xf32>
    %33 = math.tanh %32 : vector<8x32xf32>
    %34 = arith.mulf %27, %33 : vector<8x32xf32>
    %c0_21 = arith.constant 0 : index
    %c0_22 = arith.constant 0 : index
    %35 = vector.load %arg8[%c0_21, %c0_22] : memref<8x32xf32, #tpu.memory_space<vmem>>, vector<8x32xf32>
    tpu.vector_store %arg8[%c0_21, %c0_22], %34 {strides = array<i32>} : memref<8x32xf32, #tpu.memory_space<vmem>>, vector<8x32xf32>,
    %c0_23 = arith.constant 0 : index
    %c0_24 = arith.constant 0 : index
    %36 = vector.load %arg9[%c0_23, %c0_24] : memref<8x32xf32, #tpu.memory_space<vmem>>, vector<8x32xf32>
    tpu.vector_store %arg9[%c0_23, %c0_24], %32 {strides = array<i32>} : memref<8x32xf32, #tpu.memory_space<vmem>>, vector<8x32xf32>,
    %c1_i32 = arith.constant 1 : i32
    %c0_25 = arith.constant 0 : index
    %c0_26 = arith.constant 0 : index
    %37 = vector.load %arg8[%c0_25, %c0_26] : memref<8x32xf32, #tpu.memory_space<vmem>>, vector<8x32xf32>
    %38 = arith.index_cast %c1_i32 : i32 to index
    %c0_27 = arith.constant 0 : index
    %c0_28 = arith.constant 0 : index
    %39 = vector.load %arg10[%38, %c0_27, %c0_28] : memref<8x8x128xf32, #tpu.memory_space<vmem>>, vector<1x8x128xf32>
    %40 = vector.shape_cast %39 : vector<1x8x128xf32> to vector<8x128xf32>
    %cst_29 = arith.constant dense<0.000000e+00> : vector<8x128xf32>
    %41 = tpu.matmul %37, %12, %cst_29 {dimension_numbers = #tpu.dot_dimension_numbers<[1], [0], [0], [1], [0, 0, 1, 1], [], []>} : vector<8x32xf32>, vector<32x128xf32>, vector<8x128xf32> -> vector<8x128xf32>
    %42 = arith.addf %40, %41 : vector<8x128xf32>
    %43 = arith.negf %42 : vector<8x128xf32>
    %44 = math.exp %43 : vector<8x128xf32>
    %cst_30 = arith.constant 1.000000e+00 : f32
    %45 = vector.broadcast %cst_30 : f32 to vector<8x128xf32>
    %46 = arith.addf %45, %44 : vector<8x128xf32>
    %47 = arith.divf %45, %46 : vector<8x128xf32>
    %48 = math.tanh %42 : vector<8x128xf32>
    %49 = vector.extract_strided_slice %47 {offsets = [0, 0], sizes = [8, 32], strides = [1, 1]} : vector<8x128xf32> to vector<8x32xf32>
    %50 = vector.extract_strided_slice %47 {offsets = [0, 32], sizes = [8, 32], strides = [1, 1]} : vector<8x128xf32> to vector<8x32xf32>
    %51 = vector.extract_strided_slice %47 {offsets = [0, 64], sizes = [8, 32], strides = [1, 1]} : vector<8x128xf32> to vector<8x32xf32>
    %52 = vector.extract_strided_slice %48 {offsets = [0, 96], sizes = [8, 32], strides = [1, 1]} : vector<8x128xf32> to vector<8x32xf32>
    %c0_31 = arith.constant 0 : index
    %c0_32 = arith.constant 0 : index
    %53 = vector.load %arg9[%c0_31, %c0_32] : memref<8x32xf32, #tpu.memory_space<vmem>>, vector<8x32xf32>
    %54 = arith.mulf %50, %53 : vector<8x32xf32>
    %55 = arith.mulf %49, %52 : vector<8x32xf32>
    %56 = arith.addf %54, %55 : vector<8x32xf32>
    %57 = math.tanh %56 : vector<8x32xf32>
    %58 = arith.mulf %51, %57 : vector<8x32xf32>
    %c0_33 = arith.constant 0 : index
    %c0_34 = arith.constant 0 : index
    %59 = vector.load %arg8[%c0_33, %c0_34] : memref<8x32xf32, #tpu.memory_space<vmem>>, vector<8x32xf32>
    tpu.vector_store %arg8[%c0_33, %c0_34], %58 {strides = array<i32>} : memref<8x32xf32, #tpu.memory_space<vmem>>, vector<8x32xf32>,
    %c0_35 = arith.constant 0 : index
    %c0_36 = arith.constant 0 : index
    %60 = vector.load %arg9[%c0_35, %c0_36] : memref<8x32xf32, #tpu.memory_space<vmem>>, vector<8x32xf32>
    tpu.vector_store %arg9[%c0_35, %c0_36], %56 {strides = array<i32>} : memref<8x32xf32, #tpu.memory_space<vmem>>, vector<8x32xf32>,
    %c2_i32 = arith.constant 2 : i32
    %c0_37 = arith.constant 0 : index
    %c0_38 = arith.constant 0 : index
    %61 = vector.load %arg8[%c0_37, %c0_38] : memref<8x32xf32, #tpu.memory_space<vmem>>, vector<8x32xf32>
    %62 = arith.index_cast %c2_i32 : i32 to index
    %c0_39 = arith.constant 0 : index
    %c0_40 = arith.constant 0 : index
    %63 = vector.load %arg10[%62, %c0_39, %c0_40] : memref<8x8x128xf32, #tpu.memory_space<vmem>>, vector<1x8x128xf32>
    %64 = vector.shape_cast %63 : vector<1x8x128xf32> to vector<8x128xf32>
    %cst_41 = arith.constant dense<0.000000e+00> : vector<8x128xf32>
    %65 = tpu.matmul %61, %12, %cst_41 {dimension_numbers = #tpu.dot_dimension_numbers<[1], [0], [0], [1], [0, 0, 1, 1], [], []>} : vector<8x32xf32>, vector<32x128xf32>, vector<8x128xf32> -> vector<8x128xf32>
    %66 = arith.addf %64, %65 : vector<8x128xf32>
    %67 = arith.negf %66 : vector<8x128xf32>
    %68 = math.exp %67 : vector<8x128xf32>
    %cst_42 = arith.constant 1.000000e+00 : f32
    %69 = vector.broadcast %cst_42 : f32 to vector<8x128xf32>
    %70 = arith.addf %69, %68 : vector<8x128xf32>
    %71 = arith.divf %69, %70 : vector<8x128xf32>
    %72 = math.tanh %66 : vector<8x128xf32>
    %73 = vector.extract_strided_slice %71 {offsets = [0, 0], sizes = [8, 32], strides = [1, 1]} : vector<8x128xf32> to vector<8x32xf32>
    %74 = vector.extract_strided_slice %71 {offsets = [0, 32], sizes = [8, 32], strides = [1, 1]} : vector<8x128xf32> to vector<8x32xf32>
    %75 = vector.extract_strided_slice %71 {offsets = [0, 64], sizes = [8, 32], strides = [1, 1]} : vector<8x128xf32> to vector<8x32xf32>
    %76 = vector.extract_strided_slice %72 {offsets = [0, 96], sizes = [8, 32], strides = [1, 1]} : vector<8x128xf32> to vector<8x32xf32>
    %c0_43 = arith.constant 0 : index
    %c0_44 = arith.constant 0 : index
    %77 = vector.load %arg9[%c0_43, %c0_44] : memref<8x32xf32, #tpu.memory_space<vmem>>, vector<8x32xf32>
    %78 = arith.mulf %74, %77 : vector<8x32xf32>
    %79 = arith.mulf %73, %76 : vector<8x32xf32>
    %80 = arith.addf %78, %79 : vector<8x32xf32>
    %81 = math.tanh %80 : vector<8x32xf32>
    %82 = arith.mulf %75, %81 : vector<8x32xf32>
    %c0_45 = arith.constant 0 : index
    %c0_46 = arith.constant 0 : index
    %83 = vector.load %arg8[%c0_45, %c0_46] : memref<8x32xf32, #tpu.memory_space<vmem>>, vector<8x32xf32>
    tpu.vector_store %arg8[%c0_45, %c0_46], %82 {strides = array<i32>} : memref<8x32xf32, #tpu.memory_space<vmem>>, vector<8x32xf32>,
    %c0_47 = arith.constant 0 : index
    %c0_48 = arith.constant 0 : index
    %84 = vector.load %arg9[%c0_47, %c0_48] : memref<8x32xf32, #tpu.memory_space<vmem>>, vector<8x32xf32>
    tpu.vector_store %arg9[%c0_47, %c0_48], %80 {strides = array<i32>} : memref<8x32xf32, #tpu.memory_space<vmem>>, vector<8x32xf32>,
    %c3_i32 = arith.constant 3 : i32
    %c0_49 = arith.constant 0 : index
    %c0_50 = arith.constant 0 : index
    %85 = vector.load %arg8[%c0_49, %c0_50] : memref<8x32xf32, #tpu.memory_space<vmem>>, vector<8x32xf32>
    %86 = arith.index_cast %c3_i32 : i32 to index
    %c0_51 = arith.constant 0 : index
    %c0_52 = arith.constant 0 : index
    %87 = vector.load %arg10[%86, %c0_51, %c0_52] : memref<8x8x128xf32, #tpu.memory_space<vmem>>, vector<1x8x128xf32>
    %88 = vector.shape_cast %87 : vector<1x8x128xf32> to vector<8x128xf32>
    %cst_53 = arith.constant dense<0.000000e+00> : vector<8x128xf32>
    %89 = tpu.matmul %85, %12, %cst_53 {dimension_numbers = #tpu.dot_dimension_numbers<[1], [0], [0], [1], [0, 0, 1, 1], [], []>} : vector<8x32xf32>, vector<32x128xf32>, vector<8x128xf32> -> vector<8x128xf32>
    %90 = arith.addf %88, %89 : vector<8x128xf32>
    %91 = arith.negf %90 : vector<8x128xf32>
    %92 = math.exp %91 : vector<8x128xf32>
    %cst_54 = arith.constant 1.000000e+00 : f32
    %93 = vector.broadcast %cst_54 : f32 to vector<8x128xf32>
    %94 = arith.addf %93, %92 : vector<8x128xf32>
    %95 = arith.divf %93, %94 : vector<8x128xf32>
    %96 = math.tanh %90 : vector<8x128xf32>
    %97 = vector.extract_strided_slice %95 {offsets = [0, 0], sizes = [8, 32], strides = [1, 1]} : vector<8x128xf32> to vector<8x32xf32>
    %98 = vector.extract_strided_slice %95 {offsets = [0, 32], sizes = [8, 32], strides = [1, 1]} : vector<8x128xf32> to vector<8x32xf32>
    %99 = vector.extract_strided_slice %95 {offsets = [0, 64], sizes = [8, 32], strides = [1, 1]} : vector<8x128xf32> to vector<8x32xf32>
    %100 = vector.extract_strided_slice %96 {offsets = [0, 96], sizes = [8, 32], strides = [1, 1]} : vector<8x128xf32> to vector<8x32xf32>
    %c0_55 = arith.constant 0 : index
    %c0_56 = arith.constant 0 : index
    %101 = vector.load %arg9[%c0_55, %c0_56] : memref<8x32xf32, #tpu.memory_space<vmem>>, vector<8x32xf32>
    %102 = arith.mulf %98, %101 : vector<8x32xf32>
    %103 = arith.mulf %97, %100 : vector<8x32xf32>
    %104 = arith.addf %102, %103 : vector<8x32xf32>
    %105 = math.tanh %104 : vector<8x32xf32>
    %106 = arith.mulf %99, %105 : vector<8x32xf32>
    %c0_57 = arith.constant 0 : index
    %c0_58 = arith.constant 0 : index
    %107 = vector.load %arg8[%c0_57, %c0_58] : memref<8x32xf32, #tpu.memory_space<vmem>>, vector<8x32xf32>
    tpu.vector_store %arg8[%c0_57, %c0_58], %106 {strides = array<i32>} : memref<8x32xf32, #tpu.memory_space<vmem>>, vector<8x32xf32>,
    %c0_59 = arith.constant 0 : index
    %c0_60 = arith.constant 0 : index
    %108 = vector.load %arg9[%c0_59, %c0_60] : memref<8x32xf32, #tpu.memory_space<vmem>>, vector<8x32xf32>
    tpu.vector_store %arg9[%c0_59, %c0_60], %104 {strides = array<i32>} : memref<8x32xf32, #tpu.memory_space<vmem>>, vector<8x32xf32>,
    %c4_i32 = arith.constant 4 : i32
    %c0_61 = arith.constant 0 : index
    %c0_62 = arith.constant 0 : index
    %109 = vector.load %arg8[%c0_61, %c0_62] : memref<8x32xf32, #tpu.memory_space<vmem>>, vector<8x32xf32>
    %110 = arith.index_cast %c4_i32 : i32 to index
    %c0_63 = arith.constant 0 : index
    %c0_64 = arith.constant 0 : index
    %111 = vector.load %arg10[%110, %c0_63, %c0_64] : memref<8x8x128xf32, #tpu.memory_space<vmem>>, vector<1x8x128xf32>
    %112 = vector.shape_cast %111 : vector<1x8x128xf32> to vector<8x128xf32>
    %cst_65 = arith.constant dense<0.000000e+00> : vector<8x128xf32>
    %113 = tpu.matmul %109, %12, %cst_65 {dimension_numbers = #tpu.dot_dimension_numbers<[1], [0], [0], [1], [0, 0, 1, 1], [], []>} : vector<8x32xf32>, vector<32x128xf32>, vector<8x128xf32> -> vector<8x128xf32>
    %114 = arith.addf %112, %113 : vector<8x128xf32>
    %115 = arith.negf %114 : vector<8x128xf32>
    %116 = math.exp %115 : vector<8x128xf32>
    %cst_66 = arith.constant 1.000000e+00 : f32
    %117 = vector.broadcast %cst_66 : f32 to vector<8x128xf32>
    %118 = arith.addf %117, %116 : vector<8x128xf32>
    %119 = arith.divf %117, %118 : vector<8x128xf32>
    %120 = math.tanh %114 : vector<8x128xf32>
    %121 = vector.extract_strided_slice %119 {offsets = [0, 0], sizes = [8, 32], strides = [1, 1]} : vector<8x128xf32> to vector<8x32xf32>
    %122 = vector.extract_strided_slice %119 {offsets = [0, 32], sizes = [8, 32], strides = [1, 1]} : vector<8x128xf32> to vector<8x32xf32>
    %123 = vector.extract_strided_slice %119 {offsets = [0, 64], sizes = [8, 32], strides = [1, 1]} : vector<8x128xf32> to vector<8x32xf32>
    %124 = vector.extract_strided_slice %120 {offsets = [0, 96], sizes = [8, 32], strides = [1, 1]} : vector<8x128xf32> to vector<8x32xf32>
    %c0_67 = arith.constant 0 : index
    %c0_68 = arith.constant 0 : index
    %125 = vector.load %arg9[%c0_67, %c0_68] : memref<8x32xf32, #tpu.memory_space<vmem>>, vector<8x32xf32>
    %126 = arith.mulf %122, %125 : vector<8x32xf32>
    %127 = arith.mulf %121, %124 : vector<8x32xf32>
    %128 = arith.addf %126, %127 : vector<8x32xf32>
    %129 = math.tanh %128 : vector<8x32xf32>
    %130 = arith.mulf %123, %129 : vector<8x32xf32>
    %c0_69 = arith.constant 0 : index
    %c0_70 = arith.constant 0 : index
    %131 = vector.load %arg8[%c0_69, %c0_70] : memref<8x32xf32, #tpu.memory_space<vmem>>, vector<8x32xf32>
    tpu.vector_store %arg8[%c0_69, %c0_70], %130 {strides = array<i32>} : memref<8x32xf32, #tpu.memory_space<vmem>>, vector<8x32xf32>,
    %c0_71 = arith.constant 0 : index
    %c0_72 = arith.constant 0 : index
    %132 = vector.load %arg9[%c0_71, %c0_72] : memref<8x32xf32, #tpu.memory_space<vmem>>, vector<8x32xf32>
    tpu.vector_store %arg9[%c0_71, %c0_72], %128 {strides = array<i32>} : memref<8x32xf32, #tpu.memory_space<vmem>>, vector<8x32xf32>,
    %c5_i32 = arith.constant 5 : i32
    %c0_73 = arith.constant 0 : index
    %c0_74 = arith.constant 0 : index
    %133 = vector.load %arg8[%c0_73, %c0_74] : memref<8x32xf32, #tpu.memory_space<vmem>>, vector<8x32xf32>
    %134 = arith.index_cast %c5_i32 : i32 to index
    %c0_75 = arith.constant 0 : index
    %c0_76 = arith.constant 0 : index
    %135 = vector.load %arg10[%134, %c0_75, %c0_76] : memref<8x8x128xf32, #tpu.memory_space<vmem>>, vector<1x8x128xf32>
    %136 = vector.shape_cast %135 : vector<1x8x128xf32> to vector<8x128xf32>
    %cst_77 = arith.constant dense<0.000000e+00> : vector<8x128xf32>
    %137 = tpu.matmul %133, %12, %cst_77 {dimension_numbers = #tpu.dot_dimension_numbers<[1], [0], [0], [1], [0, 0, 1, 1], [], []>} : vector<8x32xf32>, vector<32x128xf32>, vector<8x128xf32> -> vector<8x128xf32>
    %138 = arith.addf %136, %137 : vector<8x128xf32>
    %139 = arith.negf %138 : vector<8x128xf32>
    %140 = math.exp %139 : vector<8x128xf32>
    %cst_78 = arith.constant 1.000000e+00 : f32
    %141 = vector.broadcast %cst_78 : f32 to vector<8x128xf32>
    %142 = arith.addf %141, %140 : vector<8x128xf32>
    %143 = arith.divf %141, %142 : vector<8x128xf32>
    %144 = math.tanh %138 : vector<8x128xf32>
    %145 = vector.extract_strided_slice %143 {offsets = [0, 0], sizes = [8, 32], strides = [1, 1]} : vector<8x128xf32> to vector<8x32xf32>
    %146 = vector.extract_strided_slice %143 {offsets = [0, 32], sizes = [8, 32], strides = [1, 1]} : vector<8x128xf32> to vector<8x32xf32>
    %147 = vector.extract_strided_slice %143 {offsets = [0, 64], sizes = [8, 32], strides = [1, 1]} : vector<8x128xf32> to vector<8x32xf32>
    %148 = vector.extract_strided_slice %144 {offsets = [0, 96], sizes = [8, 32], strides = [1, 1]} : vector<8x128xf32> to vector<8x32xf32>
    %c0_79 = arith.constant 0 : index
    %c0_80 = arith.constant 0 : index
    %149 = vector.load %arg9[%c0_79, %c0_80] : memref<8x32xf32, #tpu.memory_space<vmem>>, vector<8x32xf32>
    %150 = arith.mulf %146, %149 : vector<8x32xf32>
    %151 = arith.mulf %145, %148 : vector<8x32xf32>
    %152 = arith.addf %150, %151 : vector<8x32xf32>
    %153 = math.tanh %152 : vector<8x32xf32>
    %154 = arith.mulf %147, %153 : vector<8x32xf32>
    %c0_81 = arith.constant 0 : index
    %c0_82 = arith.constant 0 : index
    %155 = vector.load %arg8[%c0_81, %c0_82] : memref<8x32xf32, #tpu.memory_space<vmem>>, vector<8x32xf32>
    tpu.vector_store %arg8[%c0_81, %c0_82], %154 {strides = array<i32>} : memref<8x32xf32, #tpu.memory_space<vmem>>, vector<8x32xf32>,
    %c0_83 = arith.constant 0 : index
    %c0_84 = arith.constant 0 : index
    %156 = vector.load %arg9[%c0_83, %c0_84] : memref<8x32xf32, #tpu.memory_space<vmem>>, vector<8x32xf32>
    tpu.vector_store %arg9[%c0_83, %c0_84], %152 {strides = array<i32>} : memref<8x32xf32, #tpu.memory_space<vmem>>, vector<8x32xf32>,
    %c6_i32 = arith.constant 6 : i32
    %c0_85 = arith.constant 0 : index
    %c0_86 = arith.constant 0 : index
    %157 = vector.load %arg8[%c0_85, %c0_86] : memref<8x32xf32, #tpu.memory_space<vmem>>, vector<8x32xf32>
    %158 = arith.index_cast %c6_i32 : i32 to index
    %c0_87 = arith.constant 0 : index
    %c0_88 = arith.constant 0 : index
    %159 = vector.load %arg10[%158, %c0_87, %c0_88] : memref<8x8x128xf32, #tpu.memory_space<vmem>>, vector<1x8x128xf32>
    %160 = vector.shape_cast %159 : vector<1x8x128xf32> to vector<8x128xf32>
    %cst_89 = arith.constant dense<0.000000e+00> : vector<8x128xf32>
    %161 = tpu.matmul %157, %12, %cst_89 {dimension_numbers = #tpu.dot_dimension_numbers<[1], [0], [0], [1], [0, 0, 1, 1], [], []>} : vector<8x32xf32>, vector<32x128xf32>, vector<8x128xf32> -> vector<8x128xf32>
    %162 = arith.addf %160, %161 : vector<8x128xf32>
    %163 = arith.negf %162 : vector<8x128xf32>
    %164 = math.exp %163 : vector<8x128xf32>
    %cst_90 = arith.constant 1.000000e+00 : f32
    %165 = vector.broadcast %cst_90 : f32 to vector<8x128xf32>
    %166 = arith.addf %165, %164 : vector<8x128xf32>
    %167 = arith.divf %165, %166 : vector<8x128xf32>
    %168 = math.tanh %162 : vector<8x128xf32>
    %169 = vector.extract_strided_slice %167 {offsets = [0, 0], sizes = [8, 32], strides = [1, 1]} : vector<8x128xf32> to vector<8x32xf32>
    %170 = vector.extract_strided_slice %167 {offsets = [0, 32], sizes = [8, 32], strides = [1, 1]} : vector<8x128xf32> to vector<8x32xf32>
    %171 = vector.extract_strided_slice %167 {offsets = [0, 64], sizes = [8, 32], strides = [1, 1]} : vector<8x128xf32> to vector<8x32xf32>
    %172 = vector.extract_strided_slice %168 {offsets = [0, 96], sizes = [8, 32], strides = [1, 1]} : vector<8x128xf32> to vector<8x32xf32>
    %c0_91 = arith.constant 0 : index
    %c0_92 = arith.constant 0 : index
    %173 = vector.load %arg9[%c0_91, %c0_92] : memref<8x32xf32, #tpu.memory_space<vmem>>, vector<8x32xf32>
    %174 = arith.mulf %170, %173 : vector<8x32xf32>
    %175 = arith.mulf %169, %172 : vector<8x32xf32>
    %176 = arith.addf %174, %175 : vector<8x32xf32>
    %177 = math.tanh %176 : vector<8x32xf32>
    %178 = arith.mulf %171, %177 : vector<8x32xf32>
    %c0_93 = arith.constant 0 : index
    %c0_94 = arith.constant 0 : index
    %179 = vector.load %arg8[%c0_93, %c0_94] : memref<8x32xf32, #tpu.memory_space<vmem>>, vector<8x32xf32>
    tpu.vector_store %arg8[%c0_93, %c0_94], %178 {strides = array<i32>} : memref<8x32xf32, #tpu.memory_space<vmem>>, vector<8x32xf32>,
    %c0_95 = arith.constant 0 : index
    %c0_96 = arith.constant 0 : index
    %180 = vector.load %arg9[%c0_95, %c0_96] : memref<8x32xf32, #tpu.memory_space<vmem>>, vector<8x32xf32>
    tpu.vector_store %arg9[%c0_95, %c0_96], %176 {strides = array<i32>} : memref<8x32xf32, #tpu.memory_space<vmem>>, vector<8x32xf32>,
    %c7_i32 = arith.constant 7 : i32
    %c0_97 = arith.constant 0 : index
    %c0_98 = arith.constant 0 : index
    %181 = vector.load %arg8[%c0_97, %c0_98] : memref<8x32xf32, #tpu.memory_space<vmem>>, vector<8x32xf32>
    %182 = arith.index_cast %c7_i32 : i32 to index
    %c0_99 = arith.constant 0 : index
    %c0_100 = arith.constant 0 : index
    %183 = vector.load %arg10[%182, %c0_99, %c0_100] : memref<8x8x128xf32, #tpu.memory_space<vmem>>, vector<1x8x128xf32>
    %184 = vector.shape_cast %183 : vector<1x8x128xf32> to vector<8x128xf32>
    %cst_101 = arith.constant dense<0.000000e+00> : vector<8x128xf32>
    %185 = tpu.matmul %181, %12, %cst_101 {dimension_numbers = #tpu.dot_dimension_numbers<[1], [0], [0], [1], [0, 0, 1, 1], [], []>} : vector<8x32xf32>, vector<32x128xf32>, vector<8x128xf32> -> vector<8x128xf32>
    %186 = arith.addf %184, %185 : vector<8x128xf32>
    %187 = arith.negf %186 : vector<8x128xf32>
    %188 = math.exp %187 : vector<8x128xf32>
    %cst_102 = arith.constant 1.000000e+00 : f32
    %189 = vector.broadcast %cst_102 : f32 to vector<8x128xf32>
    %190 = arith.addf %189, %188 : vector<8x128xf32>
    %191 = arith.divf %189, %190 : vector<8x128xf32>
    %192 = math.tanh %186 : vector<8x128xf32>
    %193 = vector.extract_strided_slice %191 {offsets = [0, 0], sizes = [8, 32], strides = [1, 1]} : vector<8x128xf32> to vector<8x32xf32>
    %194 = vector.extract_strided_slice %191 {offsets = [0, 32], sizes = [8, 32], strides = [1, 1]} : vector<8x128xf32> to vector<8x32xf32>
    %195 = vector.extract_strided_slice %191 {offsets = [0, 64], sizes = [8, 32], strides = [1, 1]} : vector<8x128xf32> to vector<8x32xf32>
    %196 = vector.extract_strided_slice %192 {offsets = [0, 96], sizes = [8, 32], strides = [1, 1]} : vector<8x128xf32> to vector<8x32xf32>
    %c0_103 = arith.constant 0 : index
    %c0_104 = arith.constant 0 : index
    %197 = vector.load %arg9[%c0_103, %c0_104] : memref<8x32xf32, #tpu.memory_space<vmem>>, vector<8x32xf32>
    %198 = arith.mulf %194, %197 : vector<8x32xf32>
    %199 = arith.mulf %193, %196 : vector<8x32xf32>
    %200 = arith.addf %198, %199 : vector<8x32xf32>
    %201 = math.tanh %200 : vector<8x32xf32>
    %202 = arith.mulf %195, %201 : vector<8x32xf32>
    %c0_105 = arith.constant 0 : index
    %c0_106 = arith.constant 0 : index
    %203 = vector.load %arg8[%c0_105, %c0_106] : memref<8x32xf32, #tpu.memory_space<vmem>>, vector<8x32xf32>
    tpu.vector_store %arg8[%c0_105, %c0_106], %202 {strides = array<i32>} : memref<8x32xf32, #tpu.memory_space<vmem>>, vector<8x32xf32>,
    %c0_107 = arith.constant 0 : index
    %c0_108 = arith.constant 0 : index
    %204 = vector.load %arg9[%c0_107, %c0_108] : memref<8x32xf32, #tpu.memory_space<vmem>>, vector<8x32xf32>
    tpu.vector_store %arg9[%c0_107, %c0_108], %200 {strides = array<i32>} : memref<8x32xf32, #tpu.memory_space<vmem>>, vector<8x32xf32>,
    %c8_i32 = arith.constant 8 : i32
    %c0_i32_109 = arith.constant 0 : i32
    %205 = arith.cmpi eq, %arg0, %c0_i32_109 : i32
    %206 = arith.extui %205 : i1 to i32
    %c0_i32_110 = arith.constant 0 : i32
    %207 = arith.cmpi ne, %206, %c0_i32_110 : i32
    scf.if %207 {
      %c0_111 = arith.constant 0 : index
      %c0_112 = arith.constant 0 : index
      %208 = vector.load %arg8[%c0_111, %c0_112] : memref<8x32xf32, #tpu.memory_space<vmem>>, vector<8x32xf32>
      %c0_113 = arith.constant 0 : index
      %c0_114 = arith.constant 0 : index
      %209 = vector.load %arg5[%c0_113, %c0_114] : memref<32x4xf32, #tpu.memory_space<vmem>>, vector<32x4xf32>
      %cst_115 = arith.constant dense<0.000000e+00> : vector<8x4xf32>
      %210 = tpu.matmul %208, %209, %cst_115 {dimension_numbers = #tpu.dot_dimension_numbers<[1], [0], [0], [1], [0, 0, 1, 1], [], []>} : vector<8x32xf32>, vector<32x4xf32>, vector<8x4xf32> -> vector<8x4xf32>
      %c0_116 = arith.constant 0 : index
      %c0_117 = arith.constant 0 : index
      %211 = vector.load %arg6[%c0_116, %c0_117] : memref<1x4xf32, #tpu.memory_space<vmem>>, vector<1x4xf32>
      %212 = vector.broadcast %211 : vector<1x4xf32> to vector<8x4xf32>
      %213 = arith.addf %210, %212 : vector<8x4xf32>
      %cst_118 = arith.constant dense<0xFF800000> : vector<8xf32>
      %214 = vector.multi_reduction <maximumf>, %213, %cst_118 [1] : vector<8x4xf32> to vector<8xf32>
      %215 = vector.shape_cast %214 : vector<8xf32> to vector<8x1xf32>
      %216 = vector.broadcast %215 : vector<8x1xf32> to vector<8x4xf32>
      %217 = arith.subf %213, %216 : vector<8x4xf32>
      %218 = math.exp %217 : vector<8x4xf32>
      %cst_119 = arith.constant dense<0.000000e+00> : vector<8xf32>
      %219 = vector.multi_reduction <add>, %218, %cst_119 [1] : vector<8x4xf32> to vector<8xf32>
      %220 = vector.shape_cast %219 : vector<8xf32> to vector<8x1xf32>
      %221 = math.log %220 : vector<8x1xf32>
      %222 = vector.broadcast %221 : vector<8x1xf32> to vector<8x4xf32>
      %223 = arith.subf %217, %222 : vector<8x4xf32>
      %c0_120 = arith.constant 0 : index
      %c0_121 = arith.constant 0 : index
      %224 = vector.load %arg7[%c0_120, %c0_121] : memref<8x4xf32, #tpu.memory_space<vmem>>, vector<8x4xf32>
      tpu.vector_store %arg7[%c0_120, %c0_121], %223 {strides = array<i32>} : memref<8x4xf32, #tpu.memory_space<vmem>>, vector<8x4xf32>,
    } else {
    }
    return
  }
  func.func @transform_0(%arg0: i32) -> (i32, i32, i32) {
    %c0_i32 = arith.constant 0 : i32
    %c0_i32_0 = arith.constant 0 : i32
    %c0_i32_1 = arith.constant 0 : i32
    return %arg0, %c0_i32, %c0_i32_0 : i32, i32, i32
  }
  func.func @transform_1(%arg0: i32) -> (i32, i32) {
    %c0_i32 = arith.constant 0 : i32
    %c0_i32_0 = arith.constant 0 : i32
    %c0_i32_1 = arith.constant 0 : i32
    return %c0_i32, %c0_i32_0 : i32, i32
  }
  func.func @transform_2(%arg0: i32) -> (i32, i32) {
    %c0_i32 = arith.constant 0 : i32
    %c0_i32_0 = arith.constant 0 : i32
    %c0_i32_1 = arith.constant 0 : i32
    return %c0_i32, %c0_i32_0 : i32, i32
  }
  func.func @transform_3(%arg0: i32) -> (i32, i32) {
    %c0_i32 = arith.constant 0 : i32
    %c0_i32_0 = arith.constant 0 : i32
    %c0_i32_1 = arith.constant 0 : i32
    return %c0_i32, %c0_i32_0 : i32, i32
  }
  func.func @transform_4(%arg0: i32) -> (i32, i32) {
    %c0_i32 = arith.constant 0 : i32
    %c0_i32_0 = arith.constant 0 : i32
    %c0_i32_1 = arith.constant 0 : i32
    return %c0_i32, %c0_i32_0 : i32, i32
  }
  func.func @transform_5(%arg0: i32) -> (i32, i32) {
    %c0_i32 = arith.constant 0 : i32
    %c0_i32_0 = arith.constant 0 : i32
    %c0_i32_1 = arith.constant 0 : i32
    return %c0_i32, %c0_i32_0 : i32, i32
  }
  func.func @transform_6(%arg0: i32) -> (i32, i32) {
    %c0_i32 = arith.constant 0 : i32
    %c0_i32_0 = arith.constant 0 : i32
    %c0_i32_1 = arith.constant 0 : i32
    return %c0_i32, %c0_i32_0 : i32, i32
  }
}

</mosaic_0001>

<bundles_post_ra>
// kernel: tpu_custom_call.1
= control target key start
LH: loop header
LB: loop body
LE: loop exit
PB: predicated region body
PF: predicated region fallthrough
CT: control target
= control target key end

     0   :  { %11 = vsyncpa [#allocation6], 0  ;;  %s1902_s0 = inlined_call_operand.hbm [shape: f32[8,8,16], index: 0, kind: input, shape index: {}]   ;;  %s1903_s1 = inlined_call_operand.hbm [shape: f32[16,128], index: 1, kind: input, shape index: {}]   ;;  %s1904_s2 = inlined_call_operand.vmem [shape: f32[32,128], index: 2, kind: input, shape index: {}]   ;;  %s1905_s3 = inlined_call_operand.vmem [shape: f32[1,128], index: 3, kind: input, shape index: {}]   ;;  %s1906_s4 = inlined_call_operand.vmem [shape: f32[32,4], index: 4, kind: input, shape index: {}]   ;;  %s1907_s5 = inlined_call_operand.vmem [shape: f32[1,4], index: 5, kind: input, shape index: {}]   ;;  %s1908_s6 = inlined_call_operand.vmem [shape: f32[8,4], index: 6, kind: output, shape index: {}]  }
   0x1   :  { %12 = vsyncpa [#allocation8], 0  ;;  %s1634_s21 = smov [#allocation5]   ;;  %s1586_s25 = scalar_lea.hbm %s1902_s0, 1024 }
   0x2   :  { %s18_s22 = sshll.u32 %s1634_s21, 4  ;;  %p1587_p0 = scmp.ne.s32.totalorder %s1902_s0, %s1586_s25  ;;  %s19_s22 = int_to_ptr.vmem [resolvable:$true] %s18_s22 }
   0x3   :  { %p1590_p1 = scmp.lt.u32.totalorder %s1586_s25, %s1902_s0 }
   0x5   :  { %p1592_p2 = pnand %p1590_p1, %p1587_p0 }
   0x7   :  { %1595 = shalt.err (!%p1592_p2)
}
   0x8   :  { %s1596_s30 = scalar_lea.vmem %s19_s22, 1024  ;;  %p1601_p4 = scmp.lt.s32.totalorder %s19_s22, %s19_s22 }
   0x9   :  { %p1597_p3 = scmp.ne.s32.totalorder %s19_s22, %s1596_s30  ;;  %p1602_p5 = scmp.lt.s32.totalorder %s1596_s30, %s1596_s30 }
   0xb   :  { %p1603_p6 = por %p1602_p5, %p1601_p4 }
   0xd   :  { %p1604_p7 = pnand %p1603_p6, %p1597_p3 }
   0xf   :  { %1607 = shalt.err (!%p1604_p7)
}
  0x10   :  { %s1635_s7 = smov 128   ;;  %s1636_s8 = smov 8  }
  0x11   :  { %24 = dma.hbm_to_vmem [thread:$0]  %s1902_s0, 1024, %s19_s22, [#allocation6], %s1635_s7, %s1635_s7, %s1636_s8  }
  0x12   :  { %s1637_s11 = smov [#allocation7]   ;;  %s1608_s15 = scalar_lea.hbm %s1903_s1, 256 }
  0x13   :  { %s30_s12 = sshll.u32 %s1637_s11, 4  ;;  %p1609_p8 = scmp.ne.s32.totalorder %s1903_s1, %s1608_s15  ;;  %s31_s12 = int_to_ptr.vmem [resolvable:$true] %s30_s12 }
  0x14   :  { %p1612_p9 = scmp.lt.u32.totalorder %s1608_s15, %s1903_s1 }
  0x16   :  { %p1614_p10 = pnand %p1612_p9, %p1609_p8 }
  0x18   :  { %1617 = shalt.err (!%p1614_p10)
}
  0x19   :  { %s1618_s20 = scalar_lea.vmem %s31_s12, 256  ;;  %p1623_p12 = scmp.lt.s32.totalorder %s31_s12, %s31_s12 }
  0x1a   :  { %p1619_p11 = scmp.ne.s32.totalorder %s31_s12, %s1618_s20  ;;  %p1624_p13 = scmp.lt.s32.totalorder %s1618_s20, %s1618_s20 }
  0x1c   :  { %p1625_p0 = por %p1624_p13, %p1623_p12 }
  0x1e   :  { %p1626_p1 = pnand %p1625_p0, %p1619_p11 }
  0x20   :  { %1629 = shalt.err (!%p1626_p1)
}
  0x21   :  { %36 = dma.hbm_to_vmem [thread:$0]  %s1903_s1, 256, %s31_s12, [#allocation8], %s1635_s7, %s1635_s7, %s1636_s8  }
  0x22   :  { %1630 = dma.done.wait [#allocation6], 1024  }
  0x23   :  { %1631 = vsyncadd [#allocation6], 4294966272 }
  0x24   :  { %1632 = dma.done.wait [#allocation8], 256  }
  0x25   :  { %1633 = vsyncadd [#allocation8], 4294967040  ;;  %v1638_v0 = vmov 0.0|0.0   ;;  %vm1639_vm0 = vmmov 0   ;;  %v1640_v1 = vmov 0.0   ;;  %vm55_vm1 = vcmask 261120  }
  0x26   :  { %1454 = vmatprep.subr.bf16.mxu1 %v1638_v0  ;;  %1359 = vmatprep.mubr.msk.f32.mxu1 %vm1639_vm0, %v1640_v1  ;;  %56 = vst.msk [vmem:[#allocation2] sm:$0xff] %vm55_vm1, %v1640_v1  ;;  %57 = vst.msk [vmem:[#allocation3] sm:$0xff] %vm55_vm1, %v1640_v1  ;;  %vm75_vm2 = vcmask 130048   ;;  %v66_v2 = vld [vmem:[#allocation7] sm:$0xff]  ;;  %v67_v3 = vld [vmem:[#allocation7 + $0x8] sm:$0xff]  ;;  %s1641_s30 = smov 32  }
  0x27   :  { %v213_v4 = vld [vmem:[%s1904_s2] sm:$0xff]  ;;  %v1450_v5 = vpack.c.bf16 %v67_v3, %v66_v2  ;;  %v214_v6 = vld [vmem:[%s1904_s2 + $0x8] sm:$0xff]  ;;  %v58_v7 = vld [vmem:[#allocation5] sm:$0xff]  ;;  %s1643_s7 = smov 64   ;;  %vm1233_vm3 = vcmask 31744  }
  0x28   :  { %v1716_v8 = vpack.c.bf16 %v214_v6, %v213_v4  ;;  %1339 = vmatprep.mubr.msk.f32.mxu0 %vm75_vm2, %v58_v7  ;;  %v215_v9 = vld [vmem:[%s1904_s2 + $0x10] sm:$0xff]  ;;  %v216_v10 = vld [vmem:[%s1904_s2 + $0x18] sm:$0xff]  ;;  %v1747_v14 = vld [vmem:[%s1905_s3] ss:$0 sm:$0xff]  ;;  %s1642_s3 = smov 96  }
  0x29   :  { %1451 = vmatprep.subr.bf16.mxu0 %v1450_v5  ;;  %v59_v11 = vld [vmem:[#allocation5 + $0x8] sm:$0xff]  ;;  %v1726_v12 = vpack.c.bf16 %v216_v10, %v215_v9  ;;  %v60_v56 = vld [vmem:[#allocation5 + $0x10] sm:$0xff]  ;;  %v61_v57 = vld [vmem:[#allocation5 + $0x18] sm:$0xff] }
  0x2a   :  { %1456 = vmatpush3.bf16.msra.mxu1 %v1716_v8  ;;  %1453 = vmatpush3.bf16.msra.mxu0 %v1450_v5  ;;  %v62_v58 = vld [vmem:[#allocation5 + $0x20] sm:$0xff]  ;;  %v63_v59 = vld [vmem:[#allocation5 + $0x28] sm:$0xff]  ;;  %v64_v60 = vld [vmem:[#allocation5 + $0x30] sm:$0xff] }
  0x2b   :  { %1457 = vmatprep.subr.bf16.mxu1 %v1638_v0  ;;  %1466 = vmatprep.subr.bf16.mxu0 %v1638_v0  ;;  %v65_v61 = vld [vmem:[#allocation5 + $0x38] sm:$0xff] }
  0x2d   :  { %1340 = vmatmul.mubr.msk.f32.vlgmr.msra.gmra.mrb[0].mxu0 %vm75_vm2, %v59_v11  ;;  %v217_v13 = vld [vmem:[#allocation2] sm:$0xff]  ;;  %v301_v22 = vld [vmem:[#allocation3] sm:$0xff] }
  0x2e   :  { %1459 = vmatpush3.bf16.msra.mxu1 %v1726_v12  ;;  %1468 = vmatpush3.bf16.msra.mxu0 %v1716_v8 }
  0x2f   :  { %1460 = vmatprep.subr.bf16.mxu1 %v1638_v0  ;;  %1469 = vmatprep.subr.bf16.mxu0 %v1638_v0 }
  0x30   :  { %1342 = vmatprep.mubr.msk.f32.mxu0 %vm75_vm2, %v60_v56 }
  0x31   :  { %1360 = vmatmul.mubr.msk.f32.vlgmr.msra.gmra.mrb[0].mxu1 %vm55_vm1, %v217_v13  ;;  %1343 = vmatmul.mubr.msk.f32.gmra.mrb[2].mxu0 %vm75_vm2, %v61_v57 }
  0x32   :  { %1462 = vmatpush3.bf16.msra.mxu1 %v1716_v8  ;;  %1370 = vmatprep.mubr.msk.f32.mxu1 %vm1639_vm0, %v1640_v1 }
  0x33   :  { %1463 = vmatprep.subr.bf16.mxu1 %v1638_v0  ;;  %1471 = vmatpush3.bf16.msra.mxu0 %v1726_v12 }
  0x34   :  { %1478 = vmatprep.subr.bf16.mxu0 %v1638_v0  ;;  %1345 = vmatprep.mubr.msk.f32.mxu0 %vm75_vm2, %v62_v58 }
  0x35   :  { %1346 = vmatmul.mubr.msk.f32.gmra.mrb[4].mxu0 %vm75_vm2, %v63_v59 }
  0x36   :  { %1465 = vmatpush3.bf16.msra.mxu1 %v1726_v12  ;;  %1348 = vmatprep.mubr.msk.f32.mxu0 %vm75_vm2, %v64_v60 }
  0x37   :  { %1472 = vmatprep.subr.bf16.mxu1 %v1638_v0 }
  0x39   :  { %1349 = vmatmul.mubr.msk.f32.gmra.mrb[6].mxu0 %vm75_vm2, %v65_v61 }
  0x3a   :  { %1381 = vmatprep.mubr.msk.f32.mxu0 %vm1639_vm0, %v1640_v1 }
 0x100   :  { %v1341_v15 = vpop.f32.mrb[0].mxu0 }
 0x101   :  { %v166_v16 = vpop.f32.mrb[1].mxu0  ;;  %v172_v40 = vadd.f32 %v1341_v15, %v1747_v14 }
 0x102   :  { %v167_v17 = vadd.f32 %v1747_v14, %v166_v16 }
 0x104   :  { %v289_v18 = vpop.f32.mrb[0].mxu1  ;;  %v1344_v4 = vpop.f32.mrb[2].mxu0 }
 0x105   :  { %v293_v19 = vadd.f32 %v289_v18, %v167_v17  ;;  %v1361_v20 = vpop.f32.mrb[1].mxu1  ;;  %v176_v5 = vpop.f32.mrb[3].mxu0 }
 0x106   :  { %v177_v15 = vadd.f32 %v1747_v14, %v176_v5 }
 0x107   :  { %1518 = vtanh.f32 %v293_v19  ;;  %v1263_v23 = vmul.f32 -1.442695, %v293_v19 }
 0x108   :  { %v1782_v6 = vpop.f32.mrb[4].mxu0 }
 0x109   :  { %1520 = vpow2.f32 %v1263_v23  ;;  %v1784_v7 = vpop.f32.mrb[5].mxu0 }
 0x10a   :  { %v187_v59 = vadd.f32 %v1747_v14, %v1784_v7 }
 0x10c   :  { %v1794_v11 = vpop.f32.mrb[6].mxu0 }
 0x10d   :  { %v1796_v13 = vpop.f32.mrb[7].mxu0 }
 0x111   :  { %v1519_v21 = vpop.eup %1518 }
 0x112   :  { %308 = vrot.lane.b32.xlu0 %v1519_v21, %s1641_s30 }
 0x113   :  { %v1521_v24 = vpop.eup %1520 }
 0x114   :  { %v297_v25 = vadd.f32 1.0, %v1521_v24 }
 0x116   :  { %303 = vrot.lane.b32.xlu0 %v301_v22, %s1641_s30  ;;  %1522 = vrcp.f32 %v297_v25 }
 0x120   :  { %v1523_v26 = vpop.eup %1522 }
 0x184   :  { %v309_v27 = vpop.permute.xlu0 %308 }
 0x185   :  { %v311_v28 = vmul.f32 %v1523_v26, %v309_v27 }
 0x187   :  { %313 = vrot.lane.b32.xlu1 %v311_v28, %s1641_s30 }
 0x188   :  { %v304_v29 = vpop.permute.xlu0 %303 }
 0x189   :  { %v306_v30 = vmul.f32 %v1523_v26, %v304_v29 }
 0x1f9   :  { %v314_v31 = vpop.permute.xlu1 %313 }
 0x1fa   :  { %v316_v32 = vadd.f32 %v314_v31, %v306_v30 }
 0x1fc   :  { %1524 = vtanh.f32 %v316_v32 }
 0x206   :  { %v1525_v33 = vpop.eup %1524 }
 0x207   :  { %319 = vrot.lane.b32.xlu1 %v1525_v33, %s1641_s30 }
 0x20b   :  { %329 = vrot.lane.b32.xlu1 %v316_v32, %s1642_s3 }
 0x279   :  { %v320_v34 = vpop.permute.xlu1 %319 }
 0x27a   :  { %v322_v35 = vmul.f32 %v1523_v26, %v320_v34 }
 0x27c   :  { %324 = vrot.lane.b32.xlu0 %v322_v35, %s1643_s7 }
 0x27d   :  { %v330_v36 = vpop.permute.xlu1 %329 }
 0x27e   :  { %332 = vst.msk [vmem:[#allocation3] sm:$0xff] %vm55_vm1, %v330_v36 }
 0x285   :  { %v417_v37 = vld [vmem:[#allocation3] sm:$0xff] }
 0x286   :  { %419 = vrot.lane.b32.xlu1 %v417_v37, %s1641_s30  ;;  %v182_v37 = vadd.f32 %v1344_v4, %v1747_v14 }
 0x2ee   :  { %v325_v38 = vpop.permute.xlu0 %324 }
 0x2ef   :  { %327 = vst.msk [vmem:[#allocation2] sm:$0xff] %vm55_vm1, %v325_v38 }
 0x2f6   :  { %v333_v39 = vld [vmem:[#allocation2] sm:$0xff] }
 0x2f7   :  { %1371 = vmatmul.mubr.msk.f32.vlgmr.msra.gmra.mrb[2].mxu1 %vm55_vm1, %v333_v39 }
 0x2f8   :  { %1474 = vmatpush3.bf16.msra.mxu1 %v1716_v8  ;;  %1392 = vmatprep.mubr.msk.f32.mxu1 %vm1639_vm0, %v1640_v1  ;;  %v420_v51 = vpop.permute.xlu1 %419 }
 0x2f9   :  { %1475 = vmatprep.subr.bf16.mxu1 %v1638_v0 }
 0x2fc   :  { %1477 = vmatpush3.bf16.msra.mxu1 %v1726_v12 }
 0x2fd   :  { %1484 = vmatprep.subr.bf16.mxu1 %v1638_v0 }
 0x3ca   :  { %v405_v41 = vpop.f32.mrb[2].mxu1 }
 0x3cb   :  { %v409_v42 = vadd.f32 %v405_v41, %v172_v40  ;;  %v1372_v43 = vpop.f32.mrb[3].mxu1 }
 0x3cd   :  { %1526 = vtanh.f32 %v409_v42  ;;  %v1265_v45 = vmul.f32 -1.442695, %v409_v42 }
 0x3cf   :  { %1528 = vpow2.f32 %v1265_v45 }
 0x3d7   :  { %v1527_v44 = vpop.eup %1526 }
 0x3d8   :  { %424 = vrot.lane.b32.xlu0 %v1527_v44, %s1641_s30 }
 0x3d9   :  { %v1529_v46 = vpop.eup %1528 }
 0x3da   :  { %v413_v47 = vadd.f32 1.0, %v1529_v46 }
 0x3dc   :  { %1530 = vrcp.f32 %v413_v47 }
 0x3e6   :  { %v1531_v48 = vpop.eup %1530 }
 0x3e7   :  { %v422_v52 = vmul.f32 %v1531_v48, %v420_v51 }
 0x44a   :  { %v425_v49 = vpop.permute.xlu0 %424 }
 0x44b   :  { %v427_v50 = vmul.f32 %v1531_v48, %v425_v49 }
 0x44d   :  { %429 = vrot.lane.b32.xlu0 %v427_v50, %s1641_s30 }
 0x4bf   :  { %v430_v53 = vpop.permute.xlu0 %429 }
 0x4c0   :  { %v432_v54 = vadd.f32 %v430_v53, %v422_v52 }
 0x4c2   :  { %1532 = vtanh.f32 %v432_v54 }
 0x4cc   :  { %v1533_v55 = vpop.eup %1532 }
 0x4cd   :  { %435 = vrot.lane.b32.xlu1 %v1533_v55, %s1641_s30 }
 0x4d1   :  { %445 = vrot.lane.b32.xlu1 %v432_v54, %s1642_s3 }
 0x53f   :  { %v436_v62 = vpop.permute.xlu1 %435 }
 0x540   :  { %v438_v63 = vmul.f32 %v1531_v48, %v436_v62 }
 0x542   :  { %440 = vrot.lane.b32.xlu0 %v438_v63, %s1643_s7 }
 0x543   :  { %v446_v2 = vpop.permute.xlu1 %445 }
 0x544   :  { %448 = vst.msk [vmem:[#allocation3] sm:$0xff] %vm55_vm1, %v446_v2 }
 0x54b   :  { %v533_v3 = vld [vmem:[#allocation3] sm:$0xff] }
 0x54c   :  { %535 = vrot.lane.b32.xlu1 %v533_v3, %s1641_s30 }
 0x5b4   :  { %v441_v9 = vpop.permute.xlu0 %440 }
 0x5b5   :  { %443 = vst.msk [vmem:[#allocation2] sm:$0xff] %vm55_vm1, %v441_v9 }
 0x5bc   :  { %v449_v10 = vld [vmem:[#allocation2] sm:$0xff] }
 0x5bd   :  { %1382 = vmatmul.mubr.msk.f32.vlgmr.msra.gmra.mrb[8].mxu0 %vm55_vm1, %v449_v10 }
 0x5be   :  { %1480 = vmatpush3.bf16.msra.mxu0 %v1716_v8  ;;  %1403 = vmatprep.mubr.msk.f32.mxu0 %vm1639_vm0, %v1640_v1  ;;  %v536_v26 = vpop.permute.xlu1 %535 }
 0x5bf   :  { %1481 = vmatprep.subr.bf16.mxu0 %v1638_v0 }
 0x5c2   :  { %1483 = vmatpush3.bf16.msra.mxu0 %v1726_v12 }
 0x5c3   :  { %1490 = vmatprep.subr.bf16.mxu0 %v1638_v0 }
 0x690   :  { %v521_v16 = vpop.f32.mrb[8].mxu0 }
 0x691   :  { %v525_v17 = vadd.f32 %v521_v16, %v177_v15  ;;  %v1383_v18 = vpop.f32.mrb[9].mxu0 }
 0x693   :  { %1534 = vtanh.f32 %v525_v17  ;;  %v1267_v20 = vmul.f32 -1.442695, %v525_v17 }
 0x695   :  { %1536 = vpow2.f32 %v1267_v20 }
 0x69d   :  { %v1535_v19 = vpop.eup %1534 }
 0x69e   :  { %540 = vrot.lane.b32.xlu0 %v1535_v19, %s1641_s30 }
 0x69f   :  { %v1537_v21 = vpop.eup %1536 }
 0x6a0   :  { %v529_v22 = vadd.f32 1.0, %v1537_v21 }
 0x6a2   :  { %1538 = vrcp.f32 %v529_v22 }
 0x6ac   :  { %v1539_v23 = vpop.eup %1538 }
 0x6ad   :  { %v538_v27 = vmul.f32 %v1539_v23, %v536_v26 }
 0x710   :  { %v541_v24 = vpop.permute.xlu0 %540 }
 0x711   :  { %v543_v25 = vmul.f32 %v1539_v23, %v541_v24 }
 0x713   :  { %545 = vrot.lane.b32.xlu0 %v543_v25, %s1641_s30  ;;  %v192_v25 = vadd.f32 %v1782_v6, %v1747_v14 }
 0x785   :  { %v546_v28 = vpop.permute.xlu0 %545 }
 0x786   :  { %v548_v29 = vadd.f32 %v546_v28, %v538_v27 }
 0x788   :  { %1540 = vtanh.f32 %v548_v29 }
 0x792   :  { %v1541_v30 = vpop.eup %1540 }
 0x793   :  { %551 = vrot.lane.b32.xlu1 %v1541_v30, %s1641_s30 }
 0x797   :  { %561 = vrot.lane.b32.xlu1 %v548_v29, %s1642_s3 }
 0x805   :  { %v552_v31 = vpop.permute.xlu1 %551 }
 0x806   :  { %v554_v32 = vmul.f32 %v1539_v23, %v552_v31 }
 0x808   :  { %556 = vrot.lane.b32.xlu0 %v554_v32, %s1643_s7 }
 0x809   :  { %v562_v33 = vpop.permute.xlu1 %561 }
 0x80a   :  { %564 = vst.msk [vmem:[#allocation3] sm:$0xff] %vm55_vm1, %v562_v33 }
 0x811   :  { %v649_v34 = vld [vmem:[#allocation3] sm:$0xff] }
 0x812   :  { %651 = vrot.lane.b32.xlu1 %v649_v34, %s1641_s30 }
 0x87a   :  { %v557_v35 = vpop.permute.xlu0 %556 }
 0x87b   :  { %559 = vst.msk [vmem:[#allocation2] sm:$0xff] %vm55_vm1, %v557_v35 }
 0x882   :  { %v565_v36 = vld [vmem:[#allocation2] sm:$0xff] }
 0x883   :  { %1393 = vmatmul.mubr.msk.f32.vlgmr.msra.gmra.mrb[4].mxu1 %vm55_vm1, %v565_v36 }
 0x884   :  { %1486 = vmatpush3.bf16.msra.mxu1 %v1716_v8  ;;  %1414 = vmatprep.mubr.msk.f32.mxu1 %vm1639_vm0, %v1640_v1  ;;  %v652_v48 = vpop.permute.xlu1 %651 }
 0x885   :  { %1487 = vmatprep.subr.bf16.mxu1 %v1638_v0 }
 0x888   :  { %1489 = vmatpush3.bf16.msra.mxu1 %v1726_v12 }
 0x889   :  { %1496 = vmatprep.subr.bf16.mxu1 %v1638_v0 }
 0x956   :  { %v637_v38 = vpop.f32.mrb[4].mxu1 }
 0x957   :  { %v641_v39 = vadd.f32 %v637_v38, %v182_v37  ;;  %v1394_v40 = vpop.f32.mrb[5].mxu1 }
 0x959   :  { %1542 = vtanh.f32 %v641_v39  ;;  %v1269_v42 = vmul.f32 -1.442695, %v641_v39 }
 0x95b   :  { %1544 = vpow2.f32 %v1269_v42 }
 0x963   :  { %v1543_v41 = vpop.eup %1542 }
 0x964   :  { %656 = vrot.lane.b32.xlu0 %v1543_v41, %s1641_s30 }
 0x965   :  { %v1545_v43 = vpop.eup %1544 }
 0x966   :  { %v645_v44 = vadd.f32 1.0, %v1545_v43 }
 0x968   :  { %1546 = vrcp.f32 %v645_v44  ;;  %v197_v44 = vadd.f32 %v1747_v14, %v1796_v13 }
 0x972   :  { %v1547_v45 = vpop.eup %1546 }
 0x973   :  { %v654_v49 = vmul.f32 %v1547_v45, %v652_v48 }
 0x9d6   :  { %v657_v46 = vpop.permute.xlu0 %656 }
 0x9d7   :  { %v659_v47 = vmul.f32 %v1547_v45, %v657_v46 }
 0x9d9   :  { %661 = vrot.lane.b32.xlu0 %v659_v47, %s1641_s30 }
 0xa4b   :  { %v662_v50 = vpop.permute.xlu0 %661 }
 0xa4c   :  { %v664_v51 = vadd.f32 %v662_v50, %v654_v49 }
 0xa4e   :  { %1548 = vtanh.f32 %v664_v51 }
 0xa58   :  { %v1549_v52 = vpop.eup %1548 }
 0xa59   :  { %667 = vrot.lane.b32.xlu1 %v1549_v52, %s1641_s30 }
 0xa5d   :  { %677 = vrot.lane.b32.xlu1 %v664_v51, %s1642_s3 }
 0xacb   :  { %v668_v53 = vpop.permute.xlu1 %667 }
 0xacc   :  { %v670_v54 = vmul.f32 %v1547_v45, %v668_v53 }
 0xace   :  { %672 = vrot.lane.b32.xlu0 %v670_v54, %s1643_s7 }
 0xacf   :  { %v678_v55 = vpop.permute.xlu1 %677 }
 0xad0   :  { %680 = vst.msk [vmem:[#allocation3] sm:$0xff] %vm55_vm1, %v678_v55 }
 0xad7   :  { %v765_v56 = vld [vmem:[#allocation3] sm:$0xff] }
 0xad8   :  { %767 = vrot.lane.b32.xlu1 %v765_v56, %s1641_s30 }
 0xb40   :  { %v673_v57 = vpop.permute.xlu0 %672 }
 0xb41   :  { %675 = vst.msk [vmem:[#allocation2] sm:$0xff] %vm55_vm1, %v673_v57 }
 0xb48   :  { %v681_v58 = vld [vmem:[#allocation2] sm:$0xff] }
 0xb49   :  { %1404 = vmatmul.mubr.msk.f32.vlgmr.msra.gmra.mrb[10].mxu0 %vm55_vm1, %v681_v58 }
 0xb4a   :  { %1492 = vmatpush3.bf16.msra.mxu0 %v1716_v8  ;;  %1425 = vmatprep.mubr.msk.f32.mxu0 %vm1639_vm0, %v1640_v1  ;;  %v768_v15 = vpop.permute.xlu1 %767 }
 0xb4b   :  { %1493 = vmatprep.subr.bf16.mxu0 %v1638_v0 }
 0xb4e   :  { %1495 = vmatpush3.bf16.msra.mxu0 %v1726_v12 }
 0xb4f   :  { %1502 = vmatprep.subr.bf16.mxu0 %v1638_v0 }
 0xc1c   :  { %v753_v60 = vpop.f32.mrb[10].mxu0 }
 0xc1d   :  { %v757_v61 = vadd.f32 %v753_v60, %v187_v59  ;;  %v1405_v62 = vpop.f32.mrb[11].mxu0 }
 0xc1f   :  { %1550 = vtanh.f32 %v757_v61  ;;  %v1271_v2 = vmul.f32 -1.442695, %v757_v61 }
 0xc21   :  { %1552 = vpow2.f32 %v1271_v2  ;;  %v202_v2 = vadd.f32 %v1794_v11, %v1747_v14 }
 0xc29   :  { %v1551_v63 = vpop.eup %1550 }
 0xc2a   :  { %772 = vrot.lane.b32.xlu0 %v1551_v63, %s1641_s30 }
 0xc2b   :  { %v1553_v3 = vpop.eup %1552 }
 0xc2c   :  { %v761_v4 = vadd.f32 1.0, %v1553_v3 }
 0xc2e   :  { %1554 = vrcp.f32 %v761_v4 }
 0xc38   :  { %v1555_v5 = vpop.eup %1554 }
 0xc39   :  { %v770_v16 = vmul.f32 %v1555_v5, %v768_v15 }
 0xc9c   :  { %v773_v9 = vpop.permute.xlu0 %772 }
 0xc9d   :  { %v775_v10 = vmul.f32 %v1555_v5, %v773_v9 }
 0xc9f   :  { %777 = vrot.lane.b32.xlu0 %v775_v10, %s1641_s30 }
 0xd11   :  { %v778_v7 = vpop.permute.xlu0 %777 }
 0xd12   :  { %v780_v17 = vadd.f32 %v778_v7, %v770_v16 }
 0xd14   :  { %1556 = vtanh.f32 %v780_v17 }
 0xd1e   :  { %v1557_v18 = vpop.eup %1556 }
 0xd1f   :  { %783 = vrot.lane.b32.xlu1 %v1557_v18, %s1641_s30 }
 0xd23   :  { %793 = vrot.lane.b32.xlu1 %v780_v17, %s1642_s3 }
 0xd91   :  { %v784_v19 = vpop.permute.xlu1 %783 }
 0xd92   :  { %v786_v20 = vmul.f32 %v1555_v5, %v784_v19 }
 0xd94   :  { %788 = vrot.lane.b32.xlu0 %v786_v20, %s1643_s7 }
 0xd95   :  { %v794_v21 = vpop.permute.xlu1 %793 }
 0xd96   :  { %796 = vst.msk [vmem:[#allocation3] sm:$0xff] %vm55_vm1, %v794_v21 }
 0xd9d   :  { %v881_v22 = vld [vmem:[#allocation3] sm:$0xff] }
 0xd9e   :  { %883 = vrot.lane.b32.xlu1 %v881_v22, %s1641_s30  ;;  %v1149_v22 = vld [vmem:[%s1906_s4] sm:$0xff] }
 0xe06   :  { %v789_v23 = vpop.permute.xlu0 %788 }
 0xe07   :  { %791 = vst.msk [vmem:[#allocation2] sm:$0xff] %vm55_vm1, %v789_v23  ;;  %v1150_v23 = vld [vmem:[%s1906_s4 + $0x8] sm:$0xff] }
 0xe0e   :  { %v797_v24 = vld [vmem:[#allocation2] sm:$0xff] }
 0xe0f   :  { %1415 = vmatmul.mubr.msk.f32.vlgmr.msra.gmra.mrb[6].mxu1 %vm55_vm1, %v797_v24  ;;  %v1503_v24 = vpack.c.bf16 %v1150_v23, %v1149_v22 }
 0xe10   :  { %1498 = vmatpush3.bf16.msra.mxu1 %v1716_v8  ;;  %1436 = vmatprep.mubr.msk.f32.mxu1 %vm1639_vm0, %v1640_v1 }
 0xe11   :  { %1499 = vmatprep.subr.bf16.mxu1 %v1638_v0 }
 0xe14   :  { %1501 = vmatpush3.bf16.msra.mxu1 %v1726_v12  ;;  %v884_v12 = vpop.permute.xlu1 %883 }
 0xee2   :  { %v869_v26 = vpop.f32.mrb[6].mxu1 }
 0xee3   :  { %v873_v27 = vadd.f32 %v869_v26, %v192_v25  ;;  %v1416_v28 = vpop.f32.mrb[7].mxu1  ;;  %v1151_v25 = vld [vmem:[%s1906_s4 + $0x10] sm:$0xff]  ;;  %v1152_v26 = vld [vmem:[%s1906_s4 + $0x18] sm:$0xff] }
 0xee5   :  { %1558 = vtanh.f32 %v873_v27  ;;  %v1273_v30 = vmul.f32 -1.442695, %v873_v27  ;;  %v1506_v27 = vpack.c.bf16 %v1152_v26, %v1151_v25 }
 0xee7   :  { %1560 = vpow2.f32 %v1273_v30 }
 0xeef   :  { %v1559_v29 = vpop.eup %1558 }
 0xef0   :  { %888 = vrot.lane.b32.xlu0 %v1559_v29, %s1641_s30 }
 0xef1   :  { %v1561_v8 = vpop.eup %1560 }
 0xef2   :  { %v877_v31 = vadd.f32 1.0, %v1561_v8 }
 0xef4   :  { %1562 = vrcp.f32 %v877_v31  ;;  %v1278_v31 = vld [vmem:[%s1907_s5] ss:$0 sm:$0xff] }
 0xefe   :  { %v1563_v32 = vpop.eup %1562 }
 0xeff   :  { %v886_v35 = vmul.f32 %v1563_v32, %v884_v12 }
 0xf62   :  { %v889_v33 = vpop.permute.xlu0 %888 }
 0xf63   :  { %v891_v34 = vmul.f32 %v1563_v32, %v889_v33 }
 0xf65   :  { %893 = vrot.lane.b32.xlu0 %v891_v34, %s1641_s30 }
 0xfd7   :  { %v894_v6 = vpop.permute.xlu0 %893 }
 0xfd8   :  { %v896_v36 = vadd.f32 %v894_v6, %v886_v35 }
 0xfda   :  { %1564 = vtanh.f32 %v896_v36 }
 0xfe4   :  { %v1565_v37 = vpop.eup %1564 }
 0xfe5   :  { %899 = vrot.lane.b32.xlu1 %v1565_v37, %s1641_s30 }
 0xfe9   :  { %909 = vrot.lane.b32.xlu1 %v896_v36, %s1642_s3 }
0x1057   :  { %v900_v38 = vpop.permute.xlu1 %899 }
0x1058   :  { %v902_v39 = vmul.f32 %v1563_v32, %v900_v38 }
0x105a   :  { %904 = vrot.lane.b32.xlu0 %v902_v39, %s1643_s7 }
0x105b   :  { %v910_v40 = vpop.permute.xlu1 %909 }
0x105c   :  { %912 = vst.msk [vmem:[#allocation3] sm:$0xff] %vm55_vm1, %v910_v40 }
0x1063   :  { %v997_v41 = vld [vmem:[#allocation3] sm:$0xff] }
0x1064   :  { %999 = vrot.lane.b32.xlu1 %v997_v41, %s1641_s30 }
0x10cc   :  { %v905_v42 = vpop.permute.xlu0 %904 }
0x10cd   :  { %907 = vst.msk [vmem:[#allocation2] sm:$0xff] %vm55_vm1, %v905_v42 }
0x10d4   :  { %v913_v43 = vld [vmem:[#allocation2] sm:$0xff] }
0x10d5   :  { %1426 = vmatmul.mubr.msk.f32.vlgmr.msra.gmra.mrb[12].mxu0 %vm55_vm1, %v913_v43 }
0x10d6   :  { %1447 = vmatprep.mubr.msk.f32.mxu0 %vm1639_vm0, %v1640_v1  ;;  %v1000_v1 = vpop.permute.xlu1 %999  ;;  %1504 = vmatpush3.bf16.msra.mxu0 %v1503_v24 }
0x10d7   :  { %1505 = vmatprep.subr.bf16.mxu0 %v1638_v0 }
0x10da   :  { %1507 = vmatpush3.bf16.msra.mxu0 %v1506_v27 }
0x11a8   :  { %v985_v45 = vpop.f32.mrb[12].mxu0 }
0x11a9   :  { %v989_v46 = vadd.f32 %v985_v45, %v197_v44  ;;  %v1427_v47 = vpop.f32.mrb[13].mxu0 }
0x11ab   :  { %1566 = vtanh.f32 %v989_v46  ;;  %v1275_v49 = vmul.f32 -1.442695, %v989_v46 }
0x11ad   :  { %1568 = vpow2.f32 %v1275_v49 }
0x11b5   :  { %v1567_v48 = vpop.eup %1566 }
0x11b6   :  { %1004 = vrot.lane.b32.xlu0 %v1567_v48, %s1641_s30 }
0x11b7   :  { %v1569_v50 = vpop.eup %1568 }
0x11b8   :  { %v993_v51 = vadd.f32 1.0, %v1569_v50 }
0x11ba   :  { %1570 = vrcp.f32 %v993_v51 }
0x11c4   :  { %v1571_v52 = vpop.eup %1570 }
0x11c5   :  { %v1002_v55 = vmul.f32 %v1571_v52, %v1000_v1 }
0x1228   :  { %v1005_v53 = vpop.permute.xlu0 %1004 }
0x1229   :  { %v1007_v54 = vmul.f32 %v1571_v52, %v1005_v53 }
0x122b   :  { %1009 = vrot.lane.b32.xlu0 %v1007_v54, %s1641_s30 }
0x129d   :  { %v1010_v13 = vpop.permute.xlu0 %1009 }
0x129e   :  { %v1012_v56 = vadd.f32 %v1010_v13, %v1002_v55 }
0x12a0   :  { %1572 = vtanh.f32 %v1012_v56 }
0x12aa   :  { %v1573_v57 = vpop.eup %1572 }
0x12ab   :  { %1015 = vrot.lane.b32.xlu1 %v1573_v57, %s1641_s30 }
0x12af   :  { %1025 = vrot.lane.b32.xlu1 %v1012_v56, %s1642_s3 }
0x131d   :  { %v1016_v58 = vpop.permute.xlu1 %1015 }
0x131e   :  { %v1018_v59 = vmul.f32 %v1571_v52, %v1016_v58 }
0x1320   :  { %1020 = vrot.lane.b32.xlu0 %v1018_v59, %s1643_s7 }
0x1321   :  { %v1026_v60 = vpop.permute.xlu1 %1025 }
0x1322   :  { %1028 = vst.msk [vmem:[#allocation3] sm:$0xff] %vm55_vm1, %v1026_v60 }
0x1329   :  { %v1113_v61 = vld [vmem:[#allocation3] sm:$0xff] }
0x132a   :  { %1115 = vrot.lane.b32.xlu1 %v1113_v61, %s1641_s30 }
0x1392   :  { %v1021_v62 = vpop.permute.xlu0 %1020 }
0x1393   :  { %1023 = vst.msk [vmem:[#allocation2] sm:$0xff] %vm55_vm1, %v1021_v62 }
0x139a   :  { %v1029_v63 = vld [vmem:[#allocation2] sm:$0xff] }
0x139b   :  { %1437 = vmatmul.mubr.msk.f32.vlgmr.msra.gmra.mrb[8].mxu1 %vm55_vm1, %v1029_v63 }
0x139c   :  { %v1116_v19 = vpop.permute.xlu1 %1115 }
0x146e   :  { %v1101_v3 = vpop.f32.mrb[8].mxu1 }
0x146f   :  { %v1105_v4 = vadd.f32 %v1101_v3, %v202_v2  ;;  %v1438_v5 = vpop.f32.mrb[9].mxu1 }
0x1471   :  { %1574 = vtanh.f32 %v1105_v4  ;;  %v1277_v10 = vmul.f32 -1.442695, %v1105_v4 }
0x1473   :  { %1576 = vpow2.f32 %v1277_v10 }
0x147b   :  { %v1575_v9 = vpop.eup %1574 }
0x147c   :  { %1120 = vrot.lane.b32.xlu0 %v1575_v9, %s1641_s30 }
0x147d   :  { %v1577_v15 = vpop.eup %1576 }
0x147e   :  { %v1109_v16 = vadd.f32 1.0, %v1577_v15 }
0x1480   :  { %1578 = vrcp.f32 %v1109_v16 }
0x148a   :  { %v1579_v7 = vpop.eup %1578 }
0x148b   :  { %v1118_v20 = vmul.f32 %v1579_v7, %v1116_v19 }
0x14ee   :  { %v1121_v17 = vpop.permute.xlu0 %1120 }
0x14ef   :  { %v1123_v18 = vmul.f32 %v1579_v7, %v1121_v17 }
0x14f1   :  { %1125 = vrot.lane.b32.xlu0 %v1123_v18, %s1641_s30 }
0x1563   :  { %v1126_v14 = vpop.permute.xlu0 %1125 }
0x1564   :  { %v1128_v11 = vadd.f32 %v1126_v14, %v1118_v20 }
0x1566   :  { %1580 = vtanh.f32 %v1128_v11 }
0x1570   :  { %v1581_v21 = vpop.eup %1580 }
0x1571   :  { %1131 = vrot.lane.b32.xlu1 %v1581_v21, %s1641_s30 }
0x15e3   :  { %v1132_v28 = vpop.permute.xlu1 %1131 }
0x15e4   :  { %v1134_v29 = vmul.f32 %v1579_v7, %v1132_v28 }
0x15e6   :  { %1136 = vrot.lane.b32.xlu0 %v1134_v29, %s1643_s7 }
0x1658   :  { %v1137_v30 = vpop.permute.xlu0 %1136 }
0x1659   :  { %1139 = vst.msk [vmem:[#allocation2] sm:$0xff] %vm55_vm1, %v1137_v30 }
0x1660   :  { %v1148_v8 = vld [vmem:[#allocation2] sm:$0xff] }
0x1661   :  { %1448 = vmatmul.mubr.msk.f32.vlgmr.msra.gmra.mrb[14].mxu0 %vm55_vm1, %v1148_v8 }
0x1734   :  { %v1229_v32 = vpop.f32.mrb[14].mxu0 }
0x1735   :  { %v1230_v33 = vadd.f32 %v1278_v31, %v1229_v32  ;;  %v1449_v34 = vpop.f32.mrb[15].mxu0 }
0x1737   :  { %v1234_v0 = vsel %vm1233_vm3, %v1230_v33, -inf }
0x1738   :  { %1235 = vmax.xlane.f32.xlu1 %v1234_v0 }
0x17c5   :  { %v1236_v12 = vpop.xlane.xlu1 %1235 }
0x17c6   :  { %v1237_v35 = vsub.f32 %v1230_v33, %v1236_v12 }
0x17c8   :  { %v1238_v6 = vmul.f32 1.442695, %v1237_v35 }
0x17ca   :  { %1582 = vpow2.f32 %v1238_v6 }
0x17d4   :  { %v1583_v36 = vpop.eup %1582 }
0x17d5   :  { %v1240_v37 = vsel %vm1233_vm3, %v1583_v36, 0.0 }
0x17d6   :  { %1241 = vadd.xlane.f32.xlu0 %v1240_v37 }
0x17ec   :  { %1141 = vrot.lane.b32.xlu0 %v1128_v11, %s1642_s3 }
0x1863   :  { %v1242_v38 = vpop.xlane.xlu0 %1241 }
0x1864   :  { %1584 = vlog2.f32 %v1242_v38 }
0x1867   :  { %v1142_v39 = vpop.permute.xlu0 %1141 }
0x1868   :  { %1144 = vst.msk [vmem:[#allocation3] sm:$0xff] %vm55_vm1, %v1142_v39 }
0x186e   :  { %v1585_v40 = vpop.eup %1584 }
0x186f   :  { %v1244_v41 = vmul.f32 0.6931472, %v1585_v40 }
0x1871   :  { %v1245_v42 = vsub.f32 %v1237_v35, %v1244_v41 }
0x1873   :  { %1246 = vst.msk [vmem:[%s1908_s6] sm:$0xff] %vm1233_vm3, %v1245_v42 }
0x1874   :  { %1251 = vsyncpa [#allocation6], 1 }
0x1875   :  { %1252 = vsyncpa [#allocation8], 1 }

</bundles_post_ra>
